<compile_context>
chip_gen: v5e
topology: v5e:2x2
jax: 0.10.0
libtpu: 0.0.40
codegen_flags: <defaults>
</compile_context>

<pallas_src>
import jax
import jax.numpy as jnp
from jax import lax
from jax.experimental import pallas as pl
from jax.experimental.pallas import tpu as pltpu


_EPS = 1e-5
_VMEM_LIMIT = 32 * 1024 * 1024      # safe on all generations (v7x physical = 64 MiB)
_TILE_BUDGET = 6 * 1024 * 1024      # per-step double-buffered block budget


def _conv_phases(x_ref, halo_ref, w_ref):
    """Polyphase Conv1d(k=3, pad=1) of the x2-nearest-upsampled signal.

    x_ref    : (1, Cin, TL)     tile of the original (not upsampled) input
    halo_ref : (1, 1, Cin, 2)   x[:, t0-1] and x[:, t0+TL] (zeros at sequence ends)
    w_ref    : (4, Cout, Cin)   packed taps [w0, w1+w2, w0+w1, w2]

    Returns (even, odd), each (Cout, TL) f32, with the final output interleaved as
    y[:, 2j] = even[:, j], y[:, 2j+1] = odd[:, j].
    """
    x = x_ref[0]                                                     # (Cin, TL)
    halo = halo_ref[0, 0]                                            # (Cin, 2)
    tl = x.shape[1]
    # x_ext[:, i] = x_global[:, t0 - 1 + i]   (zero outside [0, L))
    x_ext = jnp.concatenate([halo[:, 0:1], x, halo[:, 1:2]], axis=1)  # (Cin, TL+2)
    x_prev = x_ext[:, 0:tl]                                          # x[:, j-1]
    x_next = x_ext[:, 2:tl + 2]                                      # x[:, j+1]

    def mm(a, b):
        return jnp.dot(a, b, precision=lax.Precision.HIGHEST,
                       preferred_element_type=jnp.float32)

    w0, w12, w01, w2 = w_ref[0], w_ref[1], w_ref[2], w_ref[3]        # (Cout, Cin) each
    even = mm(w0, x_prev) + mm(w12, x)                               # (Cout, TL)
    odd = mm(w01, x) + mm(w2, x_next)                                # (Cout, TL)
    return even, odd


def _stats_kernel(x_ref, halo_ref, w_ref, stats_ref):
    """Pass 1: per-(batch, channel) sum / sum-of-squares of the conv output,
    accumulated over the length-tile axis into a VMEM-resident (Cout, 2) block."""
    @pl.when(pl.program_id(1) == 0)
    def _():
        stats_ref[...] = jnp.zeros_like(stats_ref)

    even, odd = _conv_phases(x_ref, halo_ref, w_ref)
    s1 = (jnp.sum(even, axis=1, keepdims=True)
          + jnp.sum(odd, axis=1, keepdims=True))                     # (Cout, 1)
    s2 = (jnp.sum(even * even, axis=1, keepdims=True)
          + jnp.sum(odd * odd, axis=1, keepdims=True))               # (Cout, 1)
    stats_ref[0] += jnp.concatenate([s1, s2], axis=1)                # (Cout, 2)


def _apply_kernel(x_ref, halo_ref, w_ref, shift_ref, even_ref, odd_ref):
    """Pass 2: recompute conv phases with the BN scale pre-folded into the weights,
    add the per-channel shift, ReLU, and store both phases lane-dense."""
    even, odd = _conv_phases(x_ref, halo_ref, w_ref)
    sh = shift_ref[...]                                              # (Cout, 1)
    even_ref[0] = jnp.maximum(even + sh, 0.0).astype(even_ref.dtype)
    odd_ref[0] = jnp.maximum(odd + sh, 0.0).astype(odd_ref.dtype)


def _choose_tile(l, cin, cout):
    """Largest length tile whose double-buffered blocks fit the VMEM budget.
    Must be a multiple of 128 unless it equals L (BlockSpec rule)."""
    def per_step_bytes(tl):
        # x block + two (Cout, TL) phase outputs, f32, double-buffered.
        return 2 * 4 * tl * (cin + 2 * cout)

    if per_step_bytes(l) <= _TILE_BUDGET:
        return l                         # whole row: fewest grid steps, no halo reuse
    start = (l // 128) * 128
    for tl in range(start, 0, -128):
        if l % tl == 0 and per_step_bytes(tl) <= _TILE_BUDGET:
            return tl
    # TODO(synk): masked tail tile for huge L that is not a multiple of 128.
    raise NotImplementedError(f"L={l}: no 128-multiple tile divides it within budget")


def up_conv_forward(x, w, b, gamma, beta):
    """Up_conv forward.  x: (N, Cin, L), w: (Cout, Cin, 3), b/gamma/beta: (Cout,).

    Returns (N, Cout, 2L) f32.  `b` is accepted for API parity but cancels exactly
    under training-mode BatchNorm, so it does not affect the returned tensor.
    """
    x = x.astype(jnp.float32)
    n, cin, l = x.shape
    cout = w.shape[0]
    tl = _choose_tile(l, cin, cout)
    gl = l // tl
    grid = (n, gl)

    # ---- tiny glue-side constants (O(N*GL*Cin) and O(Cout*Cin); never O(N*L*C)) ------
    # Halo columns per tile: x[:, :, g*TL - 1] and x[:, :, (g+1)*TL], zeros at the ends.
    g_idx = jnp.arange(gl)
    prev_idx = g_idx * tl - 1
    next_idx = (g_idx + 1) * tl
    prev_col = jnp.where((prev_idx >= 0)[None, None, :],
                         x[:, :, jnp.clip(prev_idx, 0, l - 1)], 0.0)   # (N, Cin, GL)
    next_col = jnp.where((next_idx < l)[None, None, :],
                         x[:, :, jnp.clip(next_idx, 0, l - 1)], 0.0)   # (N, Cin, GL)
    halo = jnp.transpose(jnp.stack([prev_col, next_col], axis=-1),
                         (0, 2, 1, 3))                                  # (N, GL, Cin, 2)

    # Polyphase weights: x2 nearest upsample folded into the conv taps.
    wf = w.astype(jnp.float32)
    w0, w1, w2 = wf[:, :, 0], wf[:, :, 1], wf[:, :, 2]
    w_pack = jnp.stack([w0, w1 + w2, w0 + w1, w2], axis=0)              # (4, Cout, Cin)

    # ---- shared specs ----------------------------------------------------------------
    x_spec = pl.BlockSpec((1, cin, tl), lambda i, g: (i, 0, g))
    halo_spec = pl.BlockSpec((1, 1, cin, 2), lambda i, g: (i, g, 0, 0))
    w_spec = pl.BlockSpec((4, cout, cin), lambda i, g: (0, 0, 0))

    # ---- pass 1: streaming per-channel statistics (accumulated across g) -------------
    stats = pl.pallas_call(
        _stats_kernel,
        grid=grid,
        in_specs=[x_spec, halo_spec, w_spec],
        out_specs=pl.BlockSpec((1, cout, 2), lambda i, g: (i, 0, 0)),
        out_shape=jax.ShapeDtypeStruct((n, cout, 2), jnp.float32),
        compiler_params=pltpu.CompilerParams(
            dimension_semantics=("parallel", "arbitrary"),
            vmem_limit_bytes=_VMEM_LIMIT),
    )(x, halo, w_pack)
    # TODO(synk): for N == 1 on v7x, add a leading 2-way core-split axis over g and
    #             reduce the per-core partial stats here (second TensorCore otherwise idles).

    # BatchNorm1d training mode: biased variance over (N, 2L); conv bias cancels.
    # TODO(synk): E[x^2]-E[x]^2 (clamped) is less stable than two-pass (x-mean)^2 when
    #             |mean| >> std; acceptable for BN-scaled activations.
    cnt = jnp.float32(n * 2 * l)
    mean = jnp.sum(stats[:, :, 0], axis=0) / cnt
    var = jnp.maximum(jnp.sum(stats[:, :, 1], axis=0) / cnt - mean * mean, 0.0)
    scale = gamma.astype(jnp.float32) * lax.rsqrt(var + _EPS)           # (Cout,)
    shift = (beta.astype(jnp.float32) - mean * scale).reshape(cout, 1)  # (Cout, 1)
    w_scaled = w_pack * scale[None, :, None]   # fold BN scale into the tiny weight tensor

    # ---- pass 2: conv + shift + ReLU, lane-dense phase outputs ------------------------
    y_spec = pl.BlockSpec((1, cout, tl), lambda i, g: (i, 0, g))
    even, odd = pl.pallas_call(
        _apply_kernel,
        grid=grid,
        in_specs=[x_spec, halo_spec, w_spec,
                  pl.BlockSpec((cout, 1), lambda i, g: (0, 0))],
        out_specs=[y_spec, y_spec],
        out_shape=(jax.ShapeDtypeStruct((n, cout, l), jnp.float32),
                   jax.ShapeDtypeStruct((n, cout, l), jnp.float32)),
        compiler_params=pltpu.CompilerParams(
            dimension_semantics=("parallel", "parallel"),
            vmem_limit_bytes=_VMEM_LIMIT),
    )(x, halo, w_scaled, shift)

    # Interleave the phases: y[..., 2j] = even[..., j], y[..., 2j+1] = odd[..., j].
    # Wrapper-side layout plumbing (stack + layout-preserving reshape).
    # TODO(synk): move the interleave in-kernel (lane-stride-2 store) to save one
    #             streaming pass over the output.
    return jnp.stack([even, odd], axis=-1).reshape(n, cout, 2 * l)


def up_conv_reference(x, w, b, gamma, beta):
    """Pure-JAX reference mirroring the PyTorch module (training-mode BN)."""
    xu = jnp.repeat(x, 2, axis=2)                                    # (N, Cin, 2L)
    out = lax.conv_general_dilated(
        xu, w, window_strides=(1,), padding=((1, 1),),
        dimension_numbers=("NCH", "OIH", "NCH"),
        precision=lax.Precision.HIGHEST)
    out = out + b[None, :, None]
    mean = jnp.mean(out, axis=(0, 2), keepdims=True)
    var = jnp.mean((out - mean) ** 2, axis=(0, 2), keepdims=True)
    out = (out - mean) * lax.rsqrt(var + _EPS)
    out = out * gamma[None, :, None] + beta[None, :, None]
    return jnp.maximum(out, 0.0)


if __name__ == "__main__":
    # Small shapes consistent with the module: Conv1d(ch_in=4, ch_out=8, k=3).
    N, CH_IN, CH_OUT, L = 2, 4, 8, 16

    key = jax.random.PRNGKey(0)
    kx, kw, kb = jax.random.split(key, 3)
    x = jax.random.normal(kx, (N, CH_IN, L), dtype=jnp.float32)
    w = 0.1 * jax.random.normal(kw, (CH_OUT, CH_IN, 3), dtype=jnp.float32)
    b = 0.1 * jax.random.normal(kb, (CH_OUT,), dtype=jnp.float32)
    gamma = jnp.ones((CH_OUT,), dtype=jnp.float32)    # BN default init
    beta = jnp.zeros((CH_OUT,), dtype=jnp.float32)

    out = jax.jit(up_conv_forward)(x, w, b, gamma, beta)
    out = jax.block_until_ready(out)

    ref = up_conv_reference(x, w, b, gamma, beta)
    assert out.shape == (N, CH_OUT, 2 * L), out.shape
    err = float(jnp.max(jnp.abs(out - ref)))
    assert jnp.allclose(out, ref, atol=1e-4, rtol=1e-4), err

    print("KERNEL_OK")
</pallas_src>

<mosaic_0001>
module attributes {stable_mosaic.version = 11 : i64} {
  func.func @_apply_kernel(%arg0: i32, %arg1: i32, %arg2: memref<1x4x16xf32, #tpu.memory_space<vmem>>, %arg3: memref<1x1x4x2xf32, #tpu.memory_space<vmem>>, %arg4: memref<4x8x4xf32, #tpu.memory_space<vmem>>, %arg5: memref<8x1xf32, #tpu.memory_space<vmem>>, %arg6: memref<1x8x16xf32, #tpu.memory_space<vmem>>, %arg7: memref<1x8x16xf32, #tpu.memory_space<vmem>>) attributes {dimension_semantics = [#tpu.dimension_semantics<parallel>, #tpu.dimension_semantics<parallel>], iteration_bounds = array<i64: 2, 1>, scalar_prefetch = 0 : i64, scratch_operands = 0 : i64, tpu.core_type = #tpu.core_type<tc>, window_params = [{transform_indices = @transform_0, window_bounds = array<i64: 1, 4, 16>}, {transform_indices = @transform_1, window_bounds = array<i64: 1, 1, 4, 2>}, {pipeline_mode = #tpu.pipeline_mode<synchronous>, transform_indices = @transform_2, window_bounds = array<i64: 4, 8, 4>}, {pipeline_mode = #tpu.pipeline_mode<synchronous>, transform_indices = @transform_3, window_bounds = array<i64: 8, 1>}, {transform_indices = @transform_4, window_bounds = array<i64: 1, 8, 16>}, {transform_indices = @transform_5, window_bounds = array<i64: 1, 8, 16>}]} {
    %c0 = arith.constant 0 : index
    %c0_0 = arith.constant 0 : index
    %c0_1 = arith.constant 0 : index
    %0 = vector.load %arg2[%c0, %c0_0, %c0_1] : memref<1x4x16xf32, #tpu.memory_space<vmem>>, vector<1x4x16xf32>
    %1 = vector.shape_cast %0 : vector<1x4x16xf32> to vector<4x16xf32>
    %c0_2 = arith.constant 0 : index
    %c0_3 = arith.constant 0 : index
    %c0_4 = arith.constant 0 : index
    %c0_5 = arith.constant 0 : index
    %2 = vector.load %arg3[%c0_2, %c0_3, %c0_4, %c0_5] : memref<1x1x4x2xf32, #tpu.memory_space<vmem>>, vector<1x1x4x2xf32>
    %3 = vector.shape_cast %2 : vector<1x1x4x2xf32> to vector<4x2xf32>
    %4 = vector.extract_strided_slice %3 {offsets = [0, 0], sizes = [4, 1], strides = [1, 1]} : vector<4x2xf32> to vector<4x1xf32>
    %5 = vector.extract_strided_slice %3 {offsets = [0, 1], sizes = [4, 1], strides = [1, 1]} : vector<4x2xf32> to vector<4x1xf32>
    %6 = tpu.concatenate %4, %1, %5 in 1 : vector<4x1xf32>, vector<4x16xf32>, vector<4x1xf32> -> vector<4x18xf32>
    %7 = vector.extract_strided_slice %6 {offsets = [0, 0], sizes = [4, 16], strides = [1, 1]} : vector<4x18xf32> to vector<4x16xf32>
    %8 = vector.extract_strided_slice %6 {offsets = [0, 2], sizes = [4, 16], strides = [1, 1]} : vector<4x18xf32> to vector<4x16xf32>
    %c0_6 = arith.constant 0 : index
    %c0_7 = arith.constant 0 : index
    %c0_8 = arith.constant 0 : index
    %9 = vector.load %arg4[%c0_6, %c0_7, %c0_8] : memref<4x8x4xf32, #tpu.memory_space<vmem>>, vector<1x8x4xf32>
    %10 = vector.shape_cast %9 : vector<1x8x4xf32> to vector<8x4xf32>
    %c1 = arith.constant 1 : index
    %c0_9 = arith.constant 0 : index
    %c0_10 = arith.constant 0 : index
    %11 = vector.load %arg4[%c1, %c0_9, %c0_10] : memref<4x8x4xf32, #tpu.memory_space<vmem>>, vector<1x8x4xf32>
    %12 = vector.shape_cast %11 : vector<1x8x4xf32> to vector<8x4xf32>
    %c2 = arith.constant 2 : index
    %c0_11 = arith.constant 0 : index
    %c0_12 = arith.constant 0 : index
    %13 = vector.load %arg4[%c2, %c0_11, %c0_12] : memref<4x8x4xf32, #tpu.memory_space<vmem>>, vector<1x8x4xf32>
    %14 = vector.shape_cast %13 : vector<1x8x4xf32> to vector<8x4xf32>
    %c3 = arith.constant 3 : index
    %c0_13 = arith.constant 0 : index
    %c0_14 = arith.constant 0 : index
    %15 = vector.load %arg4[%c3, %c0_13, %c0_14] : memref<4x8x4xf32, #tpu.memory_space<vmem>>, vector<1x8x4xf32>
    %16 = vector.shape_cast %15 : vector<1x8x4xf32> to vector<8x4xf32>
    %cst = arith.constant dense<0.000000e+00> : vector<8x16xf32>
    %17 = tpu.matmul %10, %7, %cst {dimension_numbers = #tpu.dot_dimension_numbers<[1], [0], [0], [1], [0, 0, 1, 1], [], []>, precision = #tpu.contract_precision<fp32>} : vector<8x4xf32>, vector<4x16xf32>, vector<8x16xf32> -> vector<8x16xf32>
    %cst_15 = arith.constant dense<0.000000e+00> : vector<8x16xf32>
    %18 = tpu.matmul %12, %1, %cst_15 {dimension_numbers = #tpu.dot_dimension_numbers<[1], [0], [0], [1], [0, 0, 1, 1], [], []>, precision = #tpu.contract_precision<fp32>} : vector<8x4xf32>, vector<4x16xf32>, vector<8x16xf32> -> vector<8x16xf32>
    %19 = arith.addf %17, %18 : vector<8x16xf32>
    %cst_16 = arith.constant dense<0.000000e+00> : vector<8x16xf32>
    %20 = tpu.matmul %14, %1, %cst_16 {dimension_numbers = #tpu.dot_dimension_numbers<[1], [0], [0], [1], [0, 0, 1, 1], [], []>, precision = #tpu.contract_precision<fp32>} : vector<8x4xf32>, vector<4x16xf32>, vector<8x16xf32> -> vector<8x16xf32>
    %cst_17 = arith.constant dense<0.000000e+00> : vector<8x16xf32>
    %21 = tpu.matmul %16, %8, %cst_17 {dimension_numbers = #tpu.dot_dimension_numbers<[1], [0], [0], [1], [0, 0, 1, 1], [], []>, precision = #tpu.contract_precision<fp32>} : vector<8x4xf32>, vector<4x16xf32>, vector<8x16xf32> -> vector<8x16xf32>
    %22 = arith.addf %20, %21 : vector<8x16xf32>
    %c0_18 = arith.constant 0 : index
    %c0_19 = arith.constant 0 : index
    %23 = vector.load %arg5[%c0_18, %c0_19] : memref<8x1xf32, #tpu.memory_space<vmem>>, vector<8x1xf32>
    %24 = vector.broadcast %23 : vector<8x1xf32> to vector<8x16xf32>
    %25 = arith.addf %19, %24 : vector<8x16xf32>
    %cst_20 = arith.constant 0.000000e+00 : f32
    %26 = vector.broadcast %cst_20 : f32 to vector<8x16xf32>
    %27 = arith.maximumf %25, %26 : vector<8x16xf32>
    %c0_21 = arith.constant 0 : index
    %c0_22 = arith.constant 0 : index
    %c0_23 = arith.constant 0 : index
    %28 = vector.load %arg6[%c0_21, %c0_22, %c0_23] : memref<1x8x16xf32, #tpu.memory_space<vmem>>, vector<1x8x16xf32>
    %29 = vector.shape_cast %28 : vector<1x8x16xf32> to vector<8x16xf32>
    %30 = vector.shape_cast %27 : vector<8x16xf32> to vector<1x8x16xf32>
    tpu.vector_store %arg6[%c0_21, %c0_22, %c0_23], %30 {strides = array<i32>} : memref<1x8x16xf32, #tpu.memory_space<vmem>>, vector<1x8x16xf32>,
    %31 = vector.broadcast %23 : vector<8x1xf32> to vector<8x16xf32>
    %32 = arith.addf %22, %31 : vector<8x16xf32>
    %cst_24 = arith.constant 0.000000e+00 : f32
    %33 = vector.broadcast %cst_24 : f32 to vector<8x16xf32>
    %34 = arith.maximumf %32, %33 : vector<8x16xf32>
    %c0_25 = arith.constant 0 : index
    %c0_26 = arith.constant 0 : index
    %c0_27 = arith.constant 0 : index
    %35 = vector.load %arg7[%c0_25, %c0_26, %c0_27] : memref<1x8x16xf32, #tpu.memory_space<vmem>>, vector<1x8x16xf32>
    %36 = vector.shape_cast %35 : vector<1x8x16xf32> to vector<8x16xf32>
    %37 = vector.shape_cast %34 : vector<8x16xf32> to vector<1x8x16xf32>
    tpu.vector_store %arg7[%c0_25, %c0_26, %c0_27], %37 {strides = array<i32>} : memref<1x8x16xf32, #tpu.memory_space<vmem>>, vector<1x8x16xf32>,
    return
  }
  func.func @transform_0(%arg0: i32, %arg1: i32) -> (i32, i32, i32) {
    %c0_i32 = arith.constant 0 : i32
    %c0_i32_0 = arith.constant 0 : i32
    return %arg0, %c0_i32, %arg1 : i32, i32, i32
  }
  func.func @transform_1(%arg0: i32, %arg1: i32) -> (i32, i32, i32, i32) {
    %c0_i32 = arith.constant 0 : i32
    %c0_i32_0 = arith.constant 0 : i32
    %c0_i32_1 = arith.constant 0 : i32
    return %arg0, %arg1, %c0_i32, %c0_i32_0 : i32, i32, i32, i32
  }
  func.func @transform_2(%arg0: i32, %arg1: i32) -> (i32, i32, i32) {
    %c0_i32 = arith.constant 0 : i32
    %c0_i32_0 = arith.constant 0 : i32
    %c0_i32_1 = arith.constant 0 : i32
    %c0_i32_2 = arith.constant 0 : i32
    return %c0_i32, %c0_i32_0, %c0_i32_1 : i32, i32, i32
  }
  func.func @transform_3(%arg0: i32, %arg1: i32) -> (i32, i32) {
    %c0_i32 = arith.constant 0 : i32
    %c0_i32_0 = arith.constant 0 : i32
    %c0_i32_1 = arith.constant 0 : i32
    return %c0_i32, %c0_i32_0 : i32, i32
  }
  func.func @transform_4(%arg0: i32, %arg1: i32) -> (i32, i32, i32) {
    %c0_i32 = arith.constant 0 : i32
    %c0_i32_0 = arith.constant 0 : i32
    return %arg0, %c0_i32, %arg1 : i32, i32, i32
  }
  func.func @transform_5(%arg0: i32, %arg1: i32) -> (i32, i32, i32) {
    %c0_i32 = arith.constant 0 : i32
    %c0_i32_0 = arith.constant 0 : i32
    return %arg0, %c0_i32, %arg1 : i32, i32, i32
  }
}

module attributes {stable_mosaic.version = 11 : i64} {
  func.func @_stats_kernel(%arg0: i32, %arg1: i32, %arg2: memref<1x4x16xf32, #tpu.memory_space<vmem>>, %arg3: memref<1x1x4x2xf32, #tpu.memory_space<vmem>>, %arg4: memref<4x8x4xf32, #tpu.memory_space<vmem>>, %arg5: memref<1x8x2xf32, #tpu.memory_space<vmem>>) attributes {dimension_semantics = [#tpu.dimension_semantics<parallel>, #tpu.dimension_semantics<arbitrary>], iteration_bounds = array<i64: 2, 1>, scalar_prefetch = 0 : i64, scratch_operands = 0 : i64, tpu.core_type = #tpu.core_type<tc>, window_params = [{transform_indices = @transform_0, window_bounds = array<i64: 1, 4, 16>}, {transform_indices = @transform_1, window_bounds = array<i64: 1, 1, 4, 2>}, {pipeline_mode = #tpu.pipeline_mode<synchronous>, transform_indices = @transform_2, window_bounds = array<i64: 4, 8, 4>}, {transform_indices = @transform_3, window_bounds = array<i64: 1, 8, 2>}]} {
    %c0_i32 = arith.constant 0 : i32
    %0 = arith.cmpi eq, %arg1, %c0_i32 : i32
    %1 = arith.extui %0 : i1 to i32
    %c0_i32_0 = arith.constant 0 : i32
    %2 = arith.cmpi ne, %1, %c0_i32_0 : i32
    scf.if %2 {
      %cst_29 = arith.constant 0.000000e+00 : f32
      %45 = vector.broadcast %cst_29 : f32 to vector<1x8x2xf32>
      %c0_30 = arith.constant 0 : index
      %c0_31 = arith.constant 0 : index
      %c0_32 = arith.constant 0 : index
      %46 = vector.load %arg5[%c0_30, %c0_31, %c0_32] : memref<1x8x2xf32, #tpu.memory_space<vmem>>, vector<1x8x2xf32>
      tpu.vector_store %arg5[%c0_30, %c0_31, %c0_32], %45 {strides = array<i32>} : memref<1x8x2xf32, #tpu.memory_space<vmem>>, vector<1x8x2xf32>,
    } else {
    }
    %c0 = arith.constant 0 : index
    %c0_1 = arith.constant 0 : index
    %c0_2 = arith.constant 0 : index
    %3 = vector.load %arg2[%c0, %c0_1, %c0_2] : memref<1x4x16xf32, #tpu.memory_space<vmem>>, vector<1x4x16xf32>
    %4 = vector.shape_cast %3 : vector<1x4x16xf32> to vector<4x16xf32>
    %c0_3 = arith.constant 0 : index
    %c0_4 = arith.constant 0 : index
    %c0_5 = arith.constant 0 : index
    %c0_6 = arith.constant 0 : index
    %5 = vector.load %arg3[%c0_3, %c0_4, %c0_5, %c0_6] : memref<1x1x4x2xf32, #tpu.memory_space<vmem>>, vector<1x1x4x2xf32>
    %6 = vector.shape_cast %5 : vector<1x1x4x2xf32> to vector<4x2xf32>
    %7 = vector.extract_strided_slice %6 {offsets = [0, 0], sizes = [4, 1], strides = [1, 1]} : vector<4x2xf32> to vector<4x1xf32>
    %8 = vector.extract_strided_slice %6 {offsets = [0, 1], sizes = [4, 1], strides = [1, 1]} : vector<4x2xf32> to vector<4x1xf32>
    %9 = tpu.concatenate %7, %4, %8 in 1 : vector<4x1xf32>, vector<4x16xf32>, vector<4x1xf32> -> vector<4x18xf32>
    %10 = vector.extract_strided_slice %9 {offsets = [0, 0], sizes = [4, 16], strides = [1, 1]} : vector<4x18xf32> to vector<4x16xf32>
    %11 = vector.extract_strided_slice %9 {offsets = [0, 2], sizes = [4, 16], strides = [1, 1]} : vector<4x18xf32> to vector<4x16xf32>
    %c0_7 = arith.constant 0 : index
    %c0_8 = arith.constant 0 : index
    %c0_9 = arith.constant 0 : index
    %12 = vector.load %arg4[%c0_7, %c0_8, %c0_9] : memref<4x8x4xf32, #tpu.memory_space<vmem>>, vector<1x8x4xf32>
    %13 = vector.shape_cast %12 : vector<1x8x4xf32> to vector<8x4xf32>
    %c1 = arith.constant 1 : index
    %c0_10 = arith.constant 0 : index
    %c0_11 = arith.constant 0 : index
    %14 = vector.load %arg4[%c1, %c0_10, %c0_11] : memref<4x8x4xf32, #tpu.memory_space<vmem>>, vector<1x8x4xf32>
    %15 = vector.shape_cast %14 : vector<1x8x4xf32> to vector<8x4xf32>
    %c2 = arith.constant 2 : index
    %c0_12 = arith.constant 0 : index
    %c0_13 = arith.constant 0 : index
    %16 = vector.load %arg4[%c2, %c0_12, %c0_13] : memref<4x8x4xf32, #tpu.memory_space<vmem>>, vector<1x8x4xf32>
    %17 = vector.shape_cast %16 : vector<1x8x4xf32> to vector<8x4xf32>
    %c3 = arith.constant 3 : index
    %c0_14 = arith.constant 0 : index
    %c0_15 = arith.constant 0 : index
    %18 = vector.load %arg4[%c3, %c0_14, %c0_15] : memref<4x8x4xf32, #tpu.memory_space<vmem>>, vector<1x8x4xf32>
    %19 = vector.shape_cast %18 : vector<1x8x4xf32> to vector<8x4xf32>
    %cst = arith.constant dense<0.000000e+00> : vector<8x16xf32>
    %20 = tpu.matmul %13, %10, %cst {dimension_numbers = #tpu.dot_dimension_numbers<[1], [0], [0], [1], [0, 0, 1, 1], [], []>, precision = #tpu.contract_precision<fp32>} : vector<8x4xf32>, vector<4x16xf32>, vector<8x16xf32> -> vector<8x16xf32>
    %cst_16 = arith.constant dense<0.000000e+00> : vector<8x16xf32>
    %21 = tpu.matmul %15, %4, %cst_16 {dimension_numbers = #tpu.dot_dimension_numbers<[1], [0], [0], [1], [0, 0, 1, 1], [], []>, precision = #tpu.contract_precision<fp32>} : vector<8x4xf32>, vector<4x16xf32>, vector<8x16xf32> -> vector<8x16xf32>
    %22 = arith.addf %20, %21 : vector<8x16xf32>
    %cst_17 = arith.constant dense<0.000000e+00> : vector<8x16xf32>
    %23 = tpu.matmul %17, %4, %cst_17 {dimension_numbers = #tpu.dot_dimension_numbers<[1], [0], [0], [1], [0, 0, 1, 1], [], []>, precision = #tpu.contract_precision<fp32>} : vector<8x4xf32>, vector<4x16xf32>, vector<8x16xf32> -> vector<8x16xf32>
    %cst_18 = arith.constant dense<0.000000e+00> : vector<8x16xf32>
    %24 = tpu.matmul %19, %11, %cst_18 {dimension_numbers = #tpu.dot_dimension_numbers<[1], [0], [0], [1], [0, 0, 1, 1], [], []>, precision = #tpu.contract_precision<fp32>} : vector<8x4xf32>, vector<4x16xf32>, vector<8x16xf32> -> vector<8x16xf32>
    %25 = arith.addf %23, %24 : vector<8x16xf32>
    %cst_19 = arith.constant dense<0.000000e+00> : vector<8xf32>
    %26 = vector.multi_reduction <add>, %22, %cst_19 [1] : vector<8x16xf32> to vector<8xf32>
    %27 = vector.shape_cast %26 : vector<8xf32> to vector<8x1xf32>
    %cst_20 = arith.constant dense<0.000000e+00> : vector<8xf32>
    %28 = vector.multi_reduction <add>, %25, %cst_20 [1] : vector<8x16xf32> to vector<8xf32>
    %29 = vector.shape_cast %28 : vector<8xf32> to vector<8x1xf32>
    %30 = arith.addf %27, %29 : vector<8x1xf32>
    %31 = arith.mulf %22, %22 : vector<8x16xf32>
    %cst_21 = arith.constant dense<0.000000e+00> : vector<8xf32>
    %32 = vector.multi_reduction <add>, %31, %cst_21 [1] : vector<8x16xf32> to vector<8xf32>
    %33 = vector.shape_cast %32 : vector<8xf32> to vector<8x1xf32>
    %34 = arith.mulf %25, %25 : vector<8x16xf32>
    %cst_22 = arith.constant dense<0.000000e+00> : vector<8xf32>
    %35 = vector.multi_reduction <add>, %34, %cst_22 [1] : vector<8x16xf32> to vector<8xf32>
    %36 = vector.shape_cast %35 : vector<8xf32> to vector<8x1xf32>
    %37 = arith.addf %33, %36 : vector<8x1xf32>
    %c0_23 = arith.constant 0 : index
    %c0_24 = arith.constant 0 : index
    %c0_25 = arith.constant 0 : index
    %38 = vector.load %arg5[%c0_23, %c0_24, %c0_25] : memref<1x8x2xf32, #tpu.memory_space<vmem>>, vector<1x8x2xf32>
    %39 = vector.shape_cast %38 : vector<1x8x2xf32> to vector<8x2xf32>
    %40 = tpu.concatenate %30, %37 in 1 : vector<8x1xf32>, vector<8x1xf32> -> vector<8x2xf32>
    %41 = arith.addf %39, %40 : vector<8x2xf32>
    %c0_26 = arith.constant 0 : index
    %c0_27 = arith.constant 0 : index
    %c0_28 = arith.constant 0 : index
    %42 = vector.load %arg5[%c0_26, %c0_27, %c0_28] : memref<1x8x2xf32, #tpu.memory_space<vmem>>, vector<1x8x2xf32>
    %43 = vector.shape_cast %42 : vector<1x8x2xf32> to vector<8x2xf32>
    %44 = vector.shape_cast %41 : vector<8x2xf32> to vector<1x8x2xf32>
    tpu.vector_store %arg5[%c0_26, %c0_27, %c0_28], %44 {strides = array<i32>} : memref<1x8x2xf32, #tpu.memory_space<vmem>>, vector<1x8x2xf32>,
    return
  }
  func.func @transform_0(%arg0: i32, %arg1: i32) -> (i32, i32, i32) {
    %c0_i32 = arith.constant 0 : i32
    %c0_i32_0 = arith.constant 0 : i32
    return %arg0, %c0_i32, %arg1 : i32, i32, i32
  }
  func.func @transform_1(%arg0: i32, %arg1: i32) -> (i32, i32, i32, i32) {
    %c0_i32 = arith.constant 0 : i32
    %c0_i32_0 = arith.constant 0 : i32
    %c0_i32_1 = arith.constant 0 : i32
    return %arg0, %arg1, %c0_i32, %c0_i32_0 : i32, i32, i32, i32
  }
  func.func @transform_2(%arg0: i32, %arg1: i32) -> (i32, i32, i32) {
    %c0_i32 = arith.constant 0 : i32
    %c0_i32_0 = arith.constant 0 : i32
    %c0_i32_1 = arith.constant 0 : i32
    %c0_i32_2 = arith.constant 0 : i32
    return %c0_i32, %c0_i32_0, %c0_i32_1 : i32, i32, i32
  }
  func.func @transform_3(%arg0: i32, %arg1: i32) -> (i32, i32, i32) {
    %c0_i32 = arith.constant 0 : i32
    %c0_i32_0 = arith.constant 0 : i32
    %c0_i32_1 = arith.constant 0 : i32
    return %arg0, %c0_i32, %c0_i32_0 : i32, i32, i32
  }
}

</mosaic_0001>

<bundles_post_ra>
// kernel: up_conv_forward.2
= control target key start
LH: loop header
LB: loop body
LE: loop exit
PB: predicated region body
PF: predicated region fallthrough
CT: control target
= control target key end

     0   :  { %s1041_s12 = smov 0   ;;  %s1043_s13 = smov 0   ;;  %s1133_s0 = inlined_call_operand.vmem [shape: f32[2,4,16], index: 0, kind: input, shape index: {}]   ;;  %s1134_s1 = inlined_call_operand.vmem [shape: f32[2,1,4,2], index: 1, kind: input, shape index: {}]   ;;  %s1135_s2 = inlined_call_operand.vmem [shape: f32[4,8,4], index: 2, kind: input, shape index: {}]   ;;  %s1136_s3 = inlined_call_operand.vmem [shape: f32[2,8,2], index: 3, kind: output, shape index: {}]  }
   0x1   :  { %s1045_s14 = smov 0  }
   0x2 LB: > { %s25_s15 = sadd.s32 1, %s1011_s13  ;;  %p956_p0 = scmp.ge.s32.totalorder %s1015_s14, 1  ;;  %s1015_s14 = sphi %s1045_s14, %s13_s14   ;;  %s1011_s13 = sphi %s1043_s13, %s1138_s13   ;;  %s1007_s12 = sphi %s1041_s12, %s1137_s12  }
   0x3   : > { %p27_p1 = scmp.ge.s32.totalorder %s25_s15, 2  ;;  %p167_p2 = scmp.lt.s32.totalorder %s1015_s14, 3 }
   0x5   : > { %s1140_s15 = smov (%p27_p1, %s25_s15), 0  ;;  %p168_p3 = pnand %p956_p0, %p167_p2 }
   0x6   : > { %p199_p4 = scmp.lt.s32.totalorder (!%p168_p3), %s1007_s12, 1  ;;  %s1018_s24 = smov (!%p168_p3), 1  }
   0x7   : > { %171 = sbr.rel (%p168_p3) target bundleno = 546 (0x222), region = 32  ;;  %s1019_s28 = smov (!%p168_p3), 16  }
   0x8   : > { %s1020_s6 = smov (!%p168_p3), 126  }
   0xc   : > { %s1142_s12 = smov (!%p199_p4, %s1007_s12), 1  ;;  %vm221_vm0 = vcmask 15360   ;;  %vm248_vm1 = vcmask 1043456   ;;  %v1017_v0 = vmov 0.0   ;;  %v960_v6 = vld [vmem:[%s1135_s2 + $0x8] sm:$0xff]  ;;  %vm244_vm2 = vcmask 31744  }
   0xd   : > { %s957_s16 = sshll.u32 %s1142_s12, 2  ;;  %s959_s17 = sshll.u32 %s1142_s12, 3  ;;  %v246_v7 = vsel %vm244_vm2, %v960_v6, 0  ;;  %v237_v16 = vld [vmem:[%s1135_s2] sm:$0xff]  ;;  %vm233_vm3 = vcmask 7168   ;;  %vm235_vm4 = vcmask 138240  }
   0xe   : > { %s205_s20 = scalar_lea.vmem %s1133_s0, %s957_s16  ;;  %s1065_s23 = scalar_lea.vmem %s1136_s3, %s959_s17  ;;  %v268_v9 = vand.u32 4294901760, %v246_v7  ;;  %v398_v17 = vsel %vm244_vm2, %v237_v16, 0  ;;  %v962_v33 = vld [vmem:[%s1135_s2 + $0x18] sm:$0xff]  ;;  %v961_v37 = vld [vmem:[%s1135_s2 + $0x10] sm:$0xff]  ;;  %vm851_vm5 = vcmask 130048  }
   0xf   : > { %222 = vst.msk [vmem:[%s1065_s23] sm:$0xff] %vm221_vm0, %v1017_v0  ;;  %v223_v1 = vld [vmem:[%s205_s20] sm:$0xf]  ;;  %s212_s27 = scalar_lea.vmem %s1134_s1, %s957_s16  ;;  %v420_v18 = vand.u32 4294901760, %v398_v17  ;;  %v552_v34 = vsel %vm244_vm2, %v962_v33, 0  ;;  %v703_v38 = vsel %vm244_vm2, %v961_v37, 0 }
  0x10   : > { %226 = vrot.lane.b32.xlu0 %v223_v1, %s1018_s24  ;;  %v249_v2 = vsel %vm248_vm1, %v223_v1, 0  ;;  %v224_v5 = vld [vmem:[%s212_s27] sm:$0xf]  ;;  %v269_v11 = vsub.f32 %v246_v7, %v268_v9  ;;  %v573_v35 = vand.u32 4294901760, %v552_v34  ;;  %v722_v40 = vand.u32 4294901760, %v703_v38 }
  0x11   : > { %v1070_v3 = vand.u32 4294901760, %v249_v2  ;;  %v421_v19 = vsub.f32 %v398_v17, %v420_v18 }
  0x12   : > { %v270_v13 = vand.u32 4294901760, %v269_v11  ;;  %v574_v36 = vsub.f32 %v552_v34, %v573_v35  ;;  %v723_v42 = vsub.f32 %v703_v38, %v722_v40 }
  0x13   : > { %v1076_v4 = vsub.f32 %v249_v2, %v1070_v3  ;;  %267 = vmatpush.msra.mxu0 %v1070_v3  ;;  %343 = vmatpush.msra.mxu3 %v1070_v3  ;;  %v422_v21 = vand.u32 4294901760, %v421_v19 }
  0x14   : > { %v271_v14 = vsub.f32 %v269_v11, %v270_v13  ;;  %347 = vmatmul.f32.vlgmr.msra.gmra.mxu3 %v270_v13  ;;  %v575_v39 = vand.u32 4294901760, %v574_v36  ;;  %v724_v47 = vand.u32 4294901760, %v723_v42 }
  0x15   : > { %320 = vmatpush.msra.mxu2 %v1076_v4  ;;  %v1086_v8 = vand.u32 4294901760, %v1076_v4  ;;  %v423_v22 = vsub.f32 %v421_v19, %v422_v21 }
  0x16   : > { %323 = vmatmul.f32.vlgmr.msra.gmra.mxu2 %v269_v11  ;;  %v272_v15 = vand.u32 4294901760, %v271_v14  ;;  %v576_v41 = vsub.f32 %v574_v36, %v575_v39  ;;  %v725_v50 = vsub.f32 %v723_v42, %v724_v47 }
  0x17   : > { %v295_v10 = vsub.f32 %v1076_v4, %v1086_v8  ;;  %369 = vmatpush.msrb.mxu0 %v1086_v8  ;;  %v424_v27 = vand.u32 4294901760, %v423_v22 }
  0x18   : > { %230 = vrot.lane.b32.xlu0 %v224_v5, %s1019_s28  ;;  %273 = vmatmul.f32.vlgmr.msra.gmra.mxu0 %v272_v15  ;;  %v577_v45 = vand.u32 4294901760, %v576_v41  ;;  %v726_v53 = vand.u32 4294901760, %v725_v50 }
  0x19   : > { %v1091_v12 = vand.u32 4294901760, %v295_v10 }
  0x1b   : > { %297 = vmatpush.msra.mxu1 %v1091_v12 }
  0x1c   : > { %299 = vmatmul.f32.vlgmr.msra.gmra.mxu1 %v268_v9 }
  0x1d   : > { %391 = vmatpush.msrb.mxu1 %v1070_v3 }
  0x20   : > { %371 = vmatmul.f32.vlgmr.msrb.gmra.mxu0 %v268_v9 }
  0x24   : > { %393 = vmatmul.f32.vlgmr.msrb.gmra.mxu1 %v268_v9 }
  0x82   : > { %v227_v20 = vpop.permute.xlu0 %226 }
  0x83   : > { %v234_v23 = vsel %vm233_vm3, %v224_v5, %v227_v20 }
  0x8a   : > { %v231_v24 = vpop.permute.xlu0 %230 }
  0x8b   : > { %v236_v25 = vsel %vm235_vm4, %v234_v23, %v231_v24 }
  0x8c   : > { %549 = vrot.lane.b32.xlu1 %v236_v25, %s1020_s6  ;;  %v401_v26 = vsel %vm248_vm1, %v236_v25, 0 }
  0x8d   : > { %v418_v28 = vand.u32 4294901760, %v401_v26 }
  0x8f   : > { %v445_v29 = vsub.f32 %v401_v26, %v418_v28  ;;  %419 = vmatpush.msrb.mxu2 %v418_v28  ;;  %495 = vmatpush.msra.mxu1 %v418_v28 }
  0x90   : > { %425 = vmatmul.f32.vlgmr.msrb.gmra.mxu2 %v424_v27  ;;  %499 = vmatmul.f32.vlgmr.msra.gmra.mxu1 %v422_v21 }
  0x91   : > { %v446_v30 = vand.u32 4294901760, %v445_v29  ;;  %472 = vmatpush.msra.mxu0 %v445_v29 }
  0x92   : > { %475 = vmatmul.f32.vlgmr.msra.gmra.mxu0 %v421_v19 }
  0x93   : > { %521 = vmatpush.msra.mxu2 %v446_v30  ;;  %v447_v31 = vsub.f32 %v445_v29, %v446_v30 }
  0x95   : > { %v448_v32 = vand.u32 4294901760, %v447_v31  ;;  %v274_v55 = vpop.f32.mrf.mxu0 }
  0x97   : > { %449 = vmatpush.msrb.mxu3 %v448_v32  ;;  %v348_v59 = vpop.f32.mrf.mxu3 }
  0x98   : > { %523 = vmatmul.f32.vlgmr.msra.gmra.mxu2 %v420_v18  ;;  %451 = vmatmul.f32.vlgmr.msrb.gmra.mxu3 %v420_v18 }
  0x99   : > { %543 = vmatpush.msra.mxu3 %v418_v28  ;;  %v300_v54 = vpop.f32.mrf.mxu1  ;;  %v324_v57 = vpop.f32.mrf.mxu2 }
  0x9a   : > { %v301_v56 = vadd.f32 %v300_v54, %v274_v55 }
  0x9c   : > { %v325_v58 = vadd.f32 %v324_v57, %v301_v56 }
  0x9d   : > { %v372_v61 = vpop.f32.mrf.mxu0 }
  0x9e   : > { %v349_v60 = vadd.f32 %v348_v59, %v325_v58 }
  0xa0   : > { %545 = vmatmul.f32.vlgmr.msra.gmra.mxu3 %v420_v18  ;;  %v373_v62 = vadd.f32 %v372_v61, %v349_v60 }
  0xa1   : > { %v394_v63 = vpop.f32.mrf.mxu1 }
  0xa2   : > { %v395_v0 = vadd.f32 %v394_v63, %v373_v62 }
  0xfe   : > { %v550_v43 = vpop.permute.xlu1 %549 }
  0xff   : > { %v554_v44 = vsel %vm248_vm1, %v550_v43, 0 }
 0x100   : > { %v571_v46 = vand.u32 4294901760, %v554_v44 }
 0x102   : > { %v598_v48 = vsub.f32 %v554_v44, %v571_v46  ;;  %572 = vmatpush.msrb.mxu0 %v571_v46  ;;  %648 = vmatpush.msrb.mxu3 %v571_v46 }
 0x103   : > { %578 = vmatmul.f32.vlgmr.msrb.gmra.mxu0 %v577_v45  ;;  %652 = vmatmul.f32.vlgmr.msrb.gmra.mxu3 %v575_v39 }
 0x104   : > { %v599_v49 = vand.u32 4294901760, %v598_v48  ;;  %625 = vmatpush.msrb.mxu2 %v598_v48  ;;  %751 = vmatpush.msra.mxu3 %v1091_v12 }
 0x105   : > { %628 = vmatmul.f32.vlgmr.msrb.gmra.mxu2 %v574_v36 }
 0x106   : > { %845 = vmatpush.msrb.mxu3 %v1070_v3  ;;  %v600_v51 = vsub.f32 %v598_v48, %v599_v49  ;;  %674 = vmatpush.msra.mxu0 %v599_v49 }
 0x107   : > { %721 = vmatpush.msra.mxu2 %v1070_v3 }
 0x108   : > { %774 = vmatpush.msrb.mxu0 %v1076_v4  ;;  %v601_v52 = vand.u32 4294901760, %v600_v51 }
 0x109   : > { %823 = vmatpush.msrb.mxu2 %v1086_v8 }
 0x10a   : > { %602 = vmatpush.msrb.mxu1 %v601_v52 }
 0x10b   : > { %604 = vmatmul.f32.vlgmr.msrb.gmra.mxu1 %v573_v35  ;;  %676 = vmatmul.f32.vlgmr.msra.gmra.mxu0 %v573_v35 }
 0x10c   : > { %696 = vmatpush.msra.mxu1 %v571_v46  ;;  %753 = vmatmul.f32.vlgmr.msra.gmra.mxu3 %v722_v40 }
 0x10d   : > { %727 = vmatmul.f32.vlgmr.msra.gmra.mxu2 %v726_v53  ;;  %v500_v7 = vpop.f32.mrf.mxu1 }
 0x10e   : > { %797 = vmatpush.msrb.mxu1 %v1070_v3 }
 0x10f   : > { %v476_v5 = vpop.f32.mrf.mxu0 }
 0x113   : > { %698 = vmatmul.f32.vlgmr.msra.gmra.mxu1 %v573_v35  ;;  %777 = vmatmul.f32.vlgmr.msrb.gmra.mxu0 %v723_v42  ;;  %v426_v1 = vpop.f32.mrf.mxu2 }
 0x114   : > { %847 = vmatmul.f32.vlgmr.msrb.gmra.mxu3 %v722_v40  ;;  %v427_v2 = vadd.f32 %v426_v1, %v395_v0 }
 0x115   : > { %825 = vmatmul.f32.vlgmr.msrb.gmra.mxu2 %v722_v40 }
 0x11b   : > { %801 = vmatmul.f32.vlgmr.msrb.gmra.mxu1 %v724_v47  ;;  %v452_v4 = vpop.f32.mrf.mxu3  ;;  %v524_v9 = vpop.f32.mrf.mxu2  ;;  %v868_v47 = vld [vmem:[%s1065_s23] sm:$0xff] }
 0x11c   : > { %v453_v3 = vadd.f32 %v452_v4, %v427_v2 }
 0x11e   : > { %v477_v6 = vadd.f32 %v476_v5, %v453_v3 }
 0x120   : > { %v501_v8 = vadd.f32 %v500_v7, %v477_v6 }
 0x122   : > { %v525_v10 = vadd.f32 %v524_v9, %v501_v8 }
 0x123   : > { %v546_v11 = vpop.f32.mrf.mxu3 }
 0x124   : > { %v547_v12 = vadd.f32 %v546_v11, %v525_v10 }
 0x126   : > { %v852_v13 = vsel %vm851_vm5, %v547_v12, 0.0  ;;  %v859_v14 = vmul.f32 %v547_v12, %v547_v12 }
 0x127   : > { %853 = vadd.xlane.f32.xlu1 %v852_v13 }
 0x128   : > { %v860_v15 = vsel %vm851_vm5, %v859_v14, 0.0 }
 0x180   : > { %v579_v16 = vpop.f32.mrf.mxu0 }
 0x186   : > { %v653_v17 = vpop.f32.mrf.mxu3 }
 0x188   : > { %v605_v18 = vpop.f32.mrf.mxu1  ;;  %v629_v19 = vpop.f32.mrf.mxu2 }
 0x189   : > { %v606_v20 = vadd.f32 %v605_v18, %v579_v16  ;;  %v677_v21 = vpop.f32.mrf.mxu0 }
 0x18b   : > { %v630_v22 = vadd.f32 %v629_v19, %v606_v20 }
 0x18d   : > { %v654_v23 = vadd.f32 %v653_v17, %v630_v22 }
 0x18f   : > { %v678_v24 = vadd.f32 %v677_v21, %v654_v23  ;;  %v754_v25 = vpop.f32.mrf.mxu3 }
 0x190   : > { %v699_v26 = vpop.f32.mrf.mxu1  ;;  %v728_v27 = vpop.f32.mrf.mxu2 }
 0x191   : > { %v700_v28 = vadd.f32 %v699_v26, %v678_v24  ;;  %v778_v30 = vpop.f32.mrf.mxu0 }
 0x193   : > { %v729_v29 = vadd.f32 %v728_v27, %v700_v28 }
 0x195   : > { %v755_v31 = vadd.f32 %v754_v25, %v729_v29 }
 0x197   : > { %v779_v32 = vadd.f32 %v778_v30, %v755_v31  ;;  %v848_v36 = vpop.f32.mrf.mxu3 }
 0x198   : > { %v802_v33 = vpop.f32.mrf.mxu1  ;;  %v826_v34 = vpop.f32.mrf.mxu2 }
 0x199   : > { %v803_v35 = vadd.f32 %v802_v33, %v779_v32 }
 0x19a   : > { %v854_v43 = vpop.xlane.xlu1 %853 }
 0x19b   : > { %v827_v37 = vadd.f32 %v826_v34, %v803_v35 }
 0x19d   : > { %v849_v38 = vadd.f32 %v848_v36, %v827_v37 }
 0x19f   : > { %v855_v39 = vsel %vm851_vm5, %v849_v38, 0.0  ;;  %v863_v40 = vmul.f32 %v849_v38, %v849_v38 }
 0x1a0   : > { %856 = vadd.xlane.f32.xlu2 %v855_v39 }
 0x1a1   : > { %v864_v41 = vsel %vm851_vm5, %v863_v40, 0.0 }
 0x1a2   : > { %865 = vadd.xlane.f32.xlu0 %v864_v41 }
 0x1a8   : > { %861 = vadd.xlane.f32.xlu2 %v860_v15 }
 0x213   : > { %v857_v42 = vpop.xlane.xlu2 %856 }
 0x214   : > { %v858_v46 = vadd.f32 %v857_v42, %v854_v43 }
 0x215   : > { %v866_v44 = vpop.xlane.xlu0 %865 }
 0x21b   : > { %v862_v45 = vpop.xlane.xlu2 %861 }
 0x21c   : > { %v867_v48 = vadd.f32 %v866_v44, %v862_v45 }
 0x21e   : > { %v869_v49 = vsel %vm233_vm3, %v858_v46, %v867_v48 }
 0x21f   : > { %v870_v50 = vadd.f32 %v869_v49, %v868_v47 }
 0x221   : > { %872 = vst.msk [vmem:[%s1065_s23] sm:$0xff] %vm221_vm0, %v870_v50 }
 0x222 PF: > { %s13_s14 = sadd.s32 1, %s1015_s14   ;;  %s1137_s12 = smov %s1011_s13 }
 0x223   : > { %p10_p5 = scmp.ge.s32.totalorder %s13_s14, 4   ;;  %s1138_s13 = smov %s1140_s15 }
 0x225   :  { %12 = sbr.rel (!%p10_p5) target bundleno = 2 (0x2), region = 72 }

// kernel: up_conv_forward.3
= control target key start
LH: loop header
LB: loop body
LE: loop exit
PB: predicated region body
PF: predicated region fallthrough
CT: control target
= control target key end

     0   :  { %s1171_s18 = smov 0   ;;  %s1173_s19 = smov 0   ;;  %s1266_s0 = inlined_call_operand.vmem [shape: f32[2,4,16], index: 0, kind: input, shape index: {}]   ;;  %s1267_s1 = inlined_call_operand.vmem [shape: f32[2,1,4,2], index: 1, kind: input, shape index: {}]   ;;  %s1268_s2 = inlined_call_operand.vmem [shape: f32[4,8,4], index: 2, kind: input, shape index: {}]   ;;  %s1269_s3 = inlined_call_operand.vmem [shape: f32[8,1], index: 3, kind: input, shape index: {}]   ;;  %s1270_s4 = inlined_call_operand.vmem [shape: f32[2,8,16], index: 4, kind: output, shape index: {0}]   ;;  %s1271_s5 = inlined_call_operand.vmem [shape: f32[2,8,16], index: 5, kind: output, shape index: {1}]  }
   0x1   :  { %s1175_s20 = smov 0  }
   0x2 LB: > { %s28_s21 = sadd.s32 1, %s1131_s19  ;;  %p1073_p0 = scmp.ge.s32.totalorder %s1135_s20, 1  ;;  %s1135_s20 = sphi %s1175_s20, %s16_s20   ;;  %s1131_s19 = sphi %s1173_s19, %s1273_s19   ;;  %s1127_s18 = sphi %s1171_s18, %s1272_s18  }
   0x3   : > { %p30_p1 = scmp.ge.s32.totalorder %s28_s21, 2  ;;  %p224_p2 = scmp.lt.s32.totalorder %s1135_s20, 3 }
   0x5   : > { %s1275_s21 = smov (%p30_p1, %s28_s21), 0  ;;  %p225_p3 = pnand %p1073_p0, %p224_p2 }
   0x6   : > { %p270_p4 = scmp.lt.s32.totalorder (!%p225_p3), %s1127_s18, 1  ;;  %s1137_s26 = smov (!%p225_p3), 1  }
   0x7   : > { %228 = sbr.rel (%p225_p3) target bundleno = 420 (0x1a4), region = 36  ;;  %s1138_s30 = smov (!%p225_p3), 16  }
   0x8   : > { %s1139_s10 = smov (!%p225_p3), 126  }
   0xc   : > { %s1277_s18 = smov (!%p270_p4, %s1127_s18), 1  ;;  %vm323_vm0 = vcmask 1043456   ;;  %v1078_v5 = vld [vmem:[%s1268_s2 + $0x8] sm:$0xff]  ;;  %vm319_vm1 = vcmask 31744   ;;  %v312_v15 = vld [vmem:[%s1268_s2] sm:$0xff]  ;;  %vm308_vm2 = vcmask 7168  }
   0xd   : > { %s1074_s22 = sshll.u32 %s1277_s18, 2  ;;  %v321_v6 = vsel %vm319_vm1, %v1078_v5, 0  ;;  %v473_v16 = vsel %vm319_vm1, %v312_v15, 0  ;;  %vm310_vm3 = vcmask 138240   ;;  %v1080_v32 = vld [vmem:[%s1268_s2 + $0x18] sm:$0xff]  ;;  %v1140_v34 = vmov 0  }
   0xe   : > { %s276_s25 = scalar_lea.vmem %s1266_s0, %s1074_s22  ;;  %s283_s29 = scalar_lea.vmem %s1267_s1, %s1074_s22  ;;  %v343_v8 = vand.u32 4294901760, %v321_v6  ;;  %v495_v17 = vand.u32 4294901760, %v473_v16  ;;  %v627_v33 = vsel %vm319_vm1, %v1080_v32, 0  ;;  %1111 = vset.pattern.permute.xlu1 %v1140_v34  ;;  %1112 = vset.pattern.permute.xlu0 %v1140_v34  ;;  %v926_v36 = vld [vmem:[%s1269_s3] sm:$0xff]  ;;  %v1079_v38 = vld [vmem:[%s1268_s2 + $0x10] sm:$0xff]  ;;  %vm934_vm4 = vcmask 130048  }
   0xf   : > { %v298_v0 = vld [vmem:[%s276_s25] sm:$0xf]  ;;  %v648_v35 = vand.u32 4294901760, %v627_v33  ;;  %v778_v39 = vsel %vm319_vm1, %v1079_v38, 0  ;;  %s1076_s17 = sshll.u32 %s1277_s18, 3 }
  0x10   : > { %301 = vrot.lane.b32.xlu0 %v298_v0, %s1137_s26  ;;  %v324_v1 = vsel %vm323_vm0, %v298_v0, 0  ;;  %v299_v4 = vld [vmem:[%s283_s29] sm:$0xf]  ;;  %v344_v10 = vsub.f32 %v321_v6, %v343_v8  ;;  %v496_v18 = vsub.f32 %v473_v16, %v495_v17  ;;  %v797_v41 = vand.u32 4294901760, %v778_v39  ;;  %s290_s24 = scalar_lea.vmem %s1270_s4, %s1076_s17  ;;  %s297_s27 = scalar_lea.vmem %s1271_s5, %s1076_s17 }
  0x11   : > { %v1196_v2 = vand.u32 4294901760, %v324_v1  ;;  %v649_v37 = vsub.f32 %v627_v33, %v648_v35 }
  0x12   : > { %v345_v12 = vand.u32 4294901760, %v344_v10  ;;  %v497_v20 = vand.u32 4294901760, %v496_v18  ;;  %v798_v43 = vsub.f32 %v778_v39, %v797_v41 }
  0x13   : > { %v1202_v3 = vsub.f32 %v324_v1, %v1196_v2  ;;  %342 = vmatpush.msra.mxu0 %v1196_v2  ;;  %418 = vmatpush.msra.mxu3 %v1196_v2  ;;  %v650_v40 = vand.u32 4294901760, %v649_v37 }
  0x14   : > { %v346_v13 = vsub.f32 %v344_v10, %v345_v12  ;;  %422 = vmatmul.f32.vlgmr.msra.gmra.mxu3 %v345_v12  ;;  %v498_v21 = vsub.f32 %v496_v18, %v497_v20  ;;  %v799_v48 = vand.u32 4294901760, %v798_v43 }
  0x15   : > { %395 = vmatpush.msra.mxu2 %v1202_v3  ;;  %v1212_v7 = vand.u32 4294901760, %v1202_v3  ;;  %v651_v42 = vsub.f32 %v649_v37, %v650_v40 }
  0x16   : > { %398 = vmatmul.f32.vlgmr.msra.gmra.mxu2 %v344_v10  ;;  %v347_v14 = vand.u32 4294901760, %v346_v13  ;;  %v499_v26 = vand.u32 4294901760, %v498_v21  ;;  %v800_v51 = vsub.f32 %v798_v43, %v799_v48 }
  0x17   : > { %v370_v9 = vsub.f32 %v1202_v3, %v1212_v7  ;;  %444 = vmatpush.msrb.mxu0 %v1212_v7  ;;  %v652_v46 = vand.u32 4294901760, %v651_v42 }
  0x18   : > { %305 = vrot.lane.b32.xlu0 %v299_v4, %s1138_s30  ;;  %348 = vmatmul.f32.vlgmr.msra.gmra.mxu0 %v347_v14  ;;  %v801_v54 = vand.u32 4294901760, %v800_v51 }
  0x19   : > { %v1217_v11 = vand.u32 4294901760, %v370_v9 }
  0x1b   : > { %372 = vmatpush.msra.mxu1 %v1217_v11 }
  0x1c   : > { %374 = vmatmul.f32.vlgmr.msra.gmra.mxu1 %v343_v8 }
  0x1d   : > { %466 = vmatpush.msrb.mxu1 %v1196_v2 }
  0x20   : > { %446 = vmatmul.f32.vlgmr.msrb.gmra.mxu0 %v343_v8 }
  0x24   : > { %468 = vmatmul.f32.vlgmr.msrb.gmra.mxu1 %v343_v8 }
  0x82   : > { %v302_v19 = vpop.permute.xlu0 %301 }
  0x83   : > { %v309_v22 = vsel %vm308_vm2, %v299_v4, %v302_v19 }
  0x8a   : > { %v306_v23 = vpop.permute.xlu0 %305 }
  0x8b   : > { %v311_v24 = vsel %vm310_vm3, %v309_v22, %v306_v23 }
  0x8c   : > { %624 = vrot.lane.b32.xlu1 %v311_v24, %s1139_s10  ;;  %v476_v25 = vsel %vm323_vm0, %v311_v24, 0 }
  0x8d   : > { %v493_v27 = vand.u32 4294901760, %v476_v25 }
  0x8f   : > { %v520_v28 = vsub.f32 %v476_v25, %v493_v27  ;;  %494 = vmatpush.msrb.mxu2 %v493_v27  ;;  %570 = vmatpush.msra.mxu1 %v493_v27 }
  0x90   : > { %500 = vmatmul.f32.vlgmr.msrb.gmra.mxu2 %v499_v26  ;;  %574 = vmatmul.f32.vlgmr.msra.gmra.mxu1 %v497_v20 }
  0x91   : > { %v521_v29 = vand.u32 4294901760, %v520_v28  ;;  %547 = vmatpush.msra.mxu0 %v520_v28 }
  0x92   : > { %550 = vmatmul.f32.vlgmr.msra.gmra.mxu0 %v496_v18 }
  0x93   : > { %596 = vmatpush.msra.mxu2 %v521_v29  ;;  %v522_v30 = vsub.f32 %v520_v28, %v521_v29 }
  0x94   : > { %929 = vperm.xlu1 %1111, %v926_v36  }
  0x95   : > { %v523_v31 = vand.u32 4294901760, %v522_v30  ;;  %v349_v56 = vpop.f32.mrf.mxu0 }
  0x97   : > { %524 = vmatpush.msrb.mxu3 %v523_v31  ;;  %v423_v60 = vpop.f32.mrf.mxu3 }
  0x98   : > { %598 = vmatmul.f32.vlgmr.msra.gmra.mxu2 %v495_v17  ;;  %526 = vmatmul.f32.vlgmr.msrb.gmra.mxu3 %v495_v17 }
  0x99   : > { %618 = vmatpush.msra.mxu3 %v493_v27  ;;  %v375_v55 = vpop.f32.mrf.mxu1  ;;  %v399_v58 = vpop.f32.mrf.mxu2 }
  0x9a   : > { %v376_v57 = vadd.f32 %v375_v55, %v349_v56 }
  0x9c   : > { %v400_v59 = vadd.f32 %v399_v58, %v376_v57 }
  0x9d   : > { %v447_v62 = vpop.f32.mrf.mxu0 }
  0x9e   : > { %v424_v61 = vadd.f32 %v423_v60, %v400_v59 }
  0xa0   : > { %620 = vmatmul.f32.vlgmr.msra.gmra.mxu3 %v495_v17  ;;  %v448_v63 = vadd.f32 %v447_v62, %v424_v61 }
  0xa1   : > { %v469_v0 = vpop.f32.mrf.mxu1 }
  0xa2   : > { %v470_v1 = vadd.f32 %v469_v0, %v448_v63 }
  0xfe   : > { %v625_v44 = vpop.permute.xlu1 %624 }
  0xff   : > { %v629_v45 = vsel %vm323_vm0, %v625_v44, 0 }
 0x100   : > { %v646_v47 = vand.u32 4294901760, %v629_v45 }
 0x102   : > { %v673_v49 = vsub.f32 %v629_v45, %v646_v47  ;;  %647 = vmatpush.msrb.mxu0 %v646_v47  ;;  %723 = vmatpush.msrb.mxu3 %v646_v47 }
 0x103   : > { %653 = vmatmul.f32.vlgmr.msrb.gmra.mxu0 %v652_v46  ;;  %727 = vmatmul.f32.vlgmr.msrb.gmra.mxu3 %v650_v40 }
 0x104   : > { %v674_v50 = vand.u32 4294901760, %v673_v49  ;;  %700 = vmatpush.msrb.mxu2 %v673_v49  ;;  %826 = vmatpush.msra.mxu3 %v1217_v11 }
 0x105   : > { %703 = vmatmul.f32.vlgmr.msrb.gmra.mxu2 %v649_v37 }
 0x106   : > { %920 = vmatpush.msrb.mxu3 %v1196_v2  ;;  %v675_v52 = vsub.f32 %v673_v49, %v674_v50  ;;  %749 = vmatpush.msra.mxu0 %v674_v50  ;;  %v930_v14 = vpop.permute.xlu1 %929 }
 0x107   : > { %796 = vmatpush.msra.mxu2 %v1196_v2 }
 0x108   : > { %849 = vmatpush.msrb.mxu0 %v1202_v3  ;;  %v676_v53 = vand.u32 4294901760, %v675_v52 }
 0x109   : > { %898 = vmatpush.msrb.mxu2 %v1212_v7 }
 0x10a   : > { %677 = vmatpush.msrb.mxu1 %v676_v53 }
 0x10b   : > { %751 = vmatmul.f32.vlgmr.msra.gmra.mxu0 %v648_v35  ;;  %679 = vmatmul.f32.vlgmr.msrb.gmra.mxu1 %v648_v35 }
 0x10c   : > { %771 = vmatpush.msra.mxu1 %v646_v47  ;;  %828 = vmatmul.f32.vlgmr.msra.gmra.mxu3 %v797_v41 }
 0x10d   : > { %802 = vmatmul.f32.vlgmr.msra.gmra.mxu2 %v801_v54  ;;  %v575_v8 = vpop.f32.mrf.mxu1 }
 0x10e   : > { %872 = vmatpush.msrb.mxu1 %v1196_v2 }
 0x10f   : > { %v551_v6 = vpop.f32.mrf.mxu0 }
 0x113   : > { %852 = vmatmul.f32.vlgmr.msrb.gmra.mxu0 %v798_v43  ;;  %773 = vmatmul.f32.vlgmr.msra.gmra.mxu1 %v648_v35  ;;  %v501_v3 = vpop.f32.mrf.mxu2 }
 0x114   : > { %922 = vmatmul.f32.vlgmr.msrb.gmra.mxu3 %v797_v41  ;;  %v502_v2 = vadd.f32 %v501_v3, %v470_v1 }
 0x115   : > { %900 = vmatmul.f32.vlgmr.msrb.gmra.mxu2 %v797_v41 }
 0x11b   : > { %876 = vmatmul.f32.vlgmr.msrb.gmra.mxu1 %v799_v48  ;;  %v527_v4 = vpop.f32.mrf.mxu3  ;;  %v599_v10 = vpop.f32.mrf.mxu2 }
 0x11c   : > { %v528_v5 = vadd.f32 %v527_v4, %v502_v2 }
 0x11e   : > { %v552_v7 = vadd.f32 %v551_v6, %v528_v5 }
 0x120   : > { %v576_v9 = vadd.f32 %v575_v8, %v552_v7 }
 0x122   : > { %v600_v11 = vadd.f32 %v599_v10, %v576_v9 }
 0x123   : > { %v621_v12 = vpop.f32.mrf.mxu3 }
 0x124   : > { %v622_v13 = vadd.f32 %v621_v12, %v600_v11 }
 0x126   : > { %v932_v15 = vadd.f32 %v930_v14, %v622_v13 }
 0x128   : > { %v933_v16 = vmax.f32 %v932_v15, 0.0 }
 0x12a   : > { %935 = vst.msk [vmem:[%s290_s24] sm:$0xff] %vm934_vm4, %v933_v16 }
 0x180   : > { %v654_v17 = vpop.f32.mrf.mxu0 }
 0x186   : > { %v728_v18 = vpop.f32.mrf.mxu3 }
 0x188   : > { %v704_v19 = vpop.f32.mrf.mxu2  ;;  %v680_v20 = vpop.f32.mrf.mxu1 }
 0x189   : > { %v681_v21 = vadd.f32 %v680_v20, %v654_v17  ;;  %v752_v22 = vpop.f32.mrf.mxu0 }
 0x18b   : > { %v705_v23 = vadd.f32 %v704_v19, %v681_v21 }
 0x18d   : > { %v729_v24 = vadd.f32 %v728_v18, %v705_v23 }
 0x18f   : > { %v753_v25 = vadd.f32 %v752_v22, %v729_v24  ;;  %v829_v28 = vpop.f32.mrf.mxu3 }
 0x190   : > { %v803_v26 = vpop.f32.mrf.mxu2  ;;  %v774_v27 = vpop.f32.mrf.mxu1 }
 0x191   : > { %v775_v29 = vadd.f32 %v774_v27, %v753_v25  ;;  %v853_v31 = vpop.f32.mrf.mxu0 }
 0x193   : > { %v804_v30 = vadd.f32 %v803_v26, %v775_v29 }
 0x195   : > { %v830_v32 = vadd.f32 %v829_v28, %v804_v30 }
 0x197   : > { %v854_v33 = vadd.f32 %v853_v31, %v830_v32  ;;  %v923_v37 = vpop.f32.mrf.mxu3 }
 0x198   : > { %v877_v34 = vpop.f32.mrf.mxu1  ;;  %v901_v35 = vpop.f32.mrf.mxu2 }
 0x199   : > { %v878_v36 = vadd.f32 %v877_v34, %v854_v33 }
 0x19b   : > { %v902_v38 = vadd.f32 %v901_v35, %v878_v36 }
 0x19d   : > { %v924_v39 = vadd.f32 %v923_v37, %v902_v38 }
 0x19f   : > { %v936_v40 = vadd.f32 %v930_v14, %v924_v39 }
 0x1a1   : > { %v937_v41 = vmax.f32 %v936_v40, 0.0 }
 0x1a3   : > { %938 = vst.msk [vmem:[%s297_s27] sm:$0xff] %vm934_vm4, %v937_v41 }
 0x1a4 PF: > { %s16_s20 = sadd.s32 1, %s1135_s20   ;;  %s1272_s18 = smov %s1131_s19 }
 0x1a5   : > { %p13_p5 = scmp.ge.s32.totalorder %s16_s20, 4   ;;  %s1273_s19 = smov %s1275_s21 }
 0x1a7   :  { %15 = sbr.rel (!%p13_p5) target bundleno = 2 (0x2), region = 84 }

</bundles_post_ra>
